<compile_context>
chip_gen: v7x
topology: tpu7x:2x2x1
jax: 0.10.0
libtpu: 0.0.40
codegen_flags: <defaults>
</compile_context>

<pallas_src>
import jax
import jax.numpy as jnp
from jax.experimental import pallas as pl
from jax.experimental.pallas import tpu as pltpu


_LANES = 128      # lane width of the cumsum block (MXU friendly on v5e/v6e/v7x)
_ROWS = 8         # sublane rows per grid step -> 1024 samples per step
_NEG_PAD = -1e9   # padding log-risk (exp -> 0, excluded via censor = 0)


def _cox_loss_kernel(slr_ref, cens_ref, tri_ref, low_ref, out_ref,
                     carry_ref, lsum_ref, nev_ref):
    step = pl.program_id(0)

    @pl.when(step == 0)
    def _init():
        carry_ref[...] = jnp.zeros_like(carry_ref)
        lsum_ref[...] = jnp.zeros_like(lsum_ref)
        nev_ref[...] = jnp.zeros_like(nev_ref)

    slr = slr_ref[...]                  # (ROWS, 128), sorted desc-time, row-major
    cens = cens_ref[...]                # (ROWS, 128), 1.0/0.0 event indicators

    e = jnp.exp(slr)                    # padded positions -> exp(-1e9) == 0

    # Within-row inclusive prefix sums:
    #   intra[r, c] = sum_{c' <= c} e[r, c']
    intra = jnp.dot(e, tri_ref[...], preferred_element_type=jnp.float32)

    # Exclusive prefix over rows inside this tile:
    #   excl[r] = sum_{r' < r} sum_c e[r', c]
    prev_rows = jnp.dot(low_ref[...], e, preferred_element_type=jnp.float32)
    excl = jnp.sum(prev_rows, axis=1, keepdims=True)          # (ROWS, 1)

    # at_risk[r, c] = (exp-sum of all earlier tiles) + excl[r] + intra[r, c]
    at_risk = carry_ref[...] + excl + intra                    # (ROWS, 128)

    losses = slr - jnp.log(at_risk + 1e-15)                    # per-sample term

    # Accumulate (padded positions contribute nothing: cens == 0, e == 0).
    lsum_ref[...] = lsum_ref[...] + jnp.sum(losses * cens)
    nev_ref[...] = nev_ref[...] + jnp.sum(cens)
    carry_ref[...] = carry_ref[...] + jnp.sum(e)

    @pl.when(step == pl.num_programs(0) - 1)
    def _finalize():
        ls = lsum_ref[...]                                     # (1, 1)
        ne = nev_ref[...]                                      # (1, 1)
        # "if not losses: return 0.0" branch from the PyTorch module.
        out_ref[...] = jnp.where(ne > 0.0, -ls / ne, jnp.zeros_like(ls))


@jax.jit
def cox_loss(log_risks, times, censor):
    """Pallas-backed CoxLoss.forward(log_risks, times, censor) -> scalar f32."""
    log_risks = log_risks.reshape(-1).astype(jnp.float32)
    times = times.reshape(-1).astype(jnp.float32)
    censor = censor.reshape(-1).astype(jnp.float32)

    n = log_risks.shape[0]
    block = _ROWS * _LANES
    n_pad = ((n + block - 1) // block) * block
    m_total = n_pad // _LANES
    n_steps = n_pad // block

    # Glue (pure data movement): sort by descending survival time.
    # TODO(synk): tie ordering of argsort may differ from torch.sort(descending=True).
    order = jnp.argsort(-times)
    slr = log_risks[order]
    cens = censor[order]

    # Shift-invariance of the Cox partial likelihood: subtracting the global
    # max is mathematically a no-op but prevents exp() overflow.
    slr = slr - jnp.max(slr)

    slr_p = jnp.full((n_pad,), _NEG_PAD, dtype=jnp.float32).at[:n].set(slr)
    cens_p = jnp.zeros((n_pad,), dtype=jnp.float32).at[:n].set(cens)
    slr_p = slr_p.reshape(m_total, _LANES)      # sublane-dense layout
    cens_p = cens_p.reshape(m_total, _LANES)

    # Constant triangular masks, built once in the wrapper; their BlockSpec
    # index maps are constant so they are DMA'd once and stay VMEM resident.
    j = jax.lax.broadcasted_iota(jnp.int32, (_LANES, _LANES), 0)
    i = jax.lax.broadcasted_iota(jnp.int32, (_LANES, _LANES), 1)
    tri = (j <= i).astype(jnp.float32)          # tri[j, i] = 1 iff j <= i

    rj = jax.lax.broadcasted_iota(jnp.int32, (_ROWS, _ROWS), 0)
    rk = jax.lax.broadcasted_iota(jnp.int32, (_ROWS, _ROWS), 1)
    low = (rk < rj).astype(jnp.float32)         # low[r, r'] = 1 iff r' < r

    out = pl.pallas_call(
        _cox_loss_kernel,
        out_shape=jax.ShapeDtypeStruct((1, 1), jnp.float32),
        grid_spec=pltpu.PrefetchScalarGridSpec(
            num_scalar_prefetch=0,
            grid=(n_steps,),
            in_specs=[
                pl.BlockSpec((_ROWS, _LANES), lambda s: (s, 0)),   # log risks
                pl.BlockSpec((_ROWS, _LANES), lambda s: (s, 0)),   # censor
                pl.BlockSpec((_LANES, _LANES), lambda s: (0, 0)),  # 128x128 tri
                pl.BlockSpec((_ROWS, _ROWS), lambda s: (0, 0)),    # 8x8 strict lower
            ],
            out_specs=pl.BlockSpec((1, 1), lambda s: (0, 0)),
            scratch_shapes=[
                pltpu.VMEM((1, 1), jnp.float32),   # carry: running sum of exp
                pltpu.VMEM((1, 1), jnp.float32),   # loss_sum
                pltpu.VMEM((1, 1), jnp.float32),   # num_events
            ],
        ),
        compiler_params=pltpu.CompilerParams(
            dimension_semantics=("arbitrary",)),
    )(slr_p, cens_p, tri, low)
    return out[0, 0]


def _cox_loss_ref(log_risks, times, censor):
    """Pure-JAX reference mirroring the PyTorch loop semantics."""
    order = jnp.argsort(-times)
    slr = log_risks[order]
    sc = censor[order]
    e = jnp.exp(slr)
    at_risk = jnp.cumsum(e)
    losses = slr - jnp.log(at_risk + 1e-15)
    num_events = jnp.sum(sc)
    return jnp.where(num_events > 0,
                     -jnp.sum(losses * sc) / num_events,
                     jnp.float32(0.0))


if __name__ == "__main__":
    key = jax.random.PRNGKey(0)

    # batch=8 exercises the single-step path; batch=2500 (n_pad=3072, 3 grid
    # steps) exercises the carried at-risk prefix across grid iterations.
    for batch in (8, 2500):
        k1, k2, k3, key = jax.random.split(key, 4)
        log_risks = jax.random.normal(k1, (batch,), dtype=jnp.float32)
        times = jax.random.uniform(k2, (batch,), dtype=jnp.float32,
                                   minval=0.1, maxval=10.0)
        censor = (jax.random.uniform(k3, (batch,)) > 0.4).astype(jnp.float32)

        loss = cox_loss(log_risks, times, censor)
        jax.block_until_ready(loss)

        ref = _cox_loss_ref(log_risks, times, censor)
        assert jnp.allclose(loss, ref, atol=1e-4, rtol=1e-4), (batch, loss, ref)

    print("KERNEL_OK")
</pallas_src>

<mosaic_0001>
module attributes {stable_mosaic.version = 11 : i64} {
  func.func @_cox_loss_kernel(%arg0: i32, %arg1: memref<8x128xf32, #tpu.memory_space<vmem>>, %arg2: memref<8x128xf32, #tpu.memory_space<vmem>>, %arg3: memref<128x128xf32, #tpu.memory_space<vmem>>, %arg4: memref<8x8xf32, #tpu.memory_space<vmem>>, %arg5: memref<1x1xf32, #tpu.memory_space<vmem>>, %arg6: memref<1x1xf32, #tpu.memory_space<vmem>>, %arg7: memref<1x1xf32, #tpu.memory_space<vmem>>, %arg8: memref<1x1xf32, #tpu.memory_space<vmem>>) attributes {dimension_semantics = [#tpu.dimension_semantics<arbitrary>], iteration_bounds = array<i64: 1>, scalar_prefetch = 0 : i64, scratch_operands = 3 : i64, tpu.core_type = #tpu.core_type<tc>, window_params = [{transform_indices = @transform_0, window_bounds = array<i64: 8, 128>}, {transform_indices = @transform_1, window_bounds = array<i64: 8, 128>}, {pipeline_mode = #tpu.pipeline_mode<synchronous>, transform_indices = @transform_2, window_bounds = array<i64: 128, 128>}, {pipeline_mode = #tpu.pipeline_mode<synchronous>, transform_indices = @transform_3, window_bounds = array<i64: 8, 8>}, {pipeline_mode = #tpu.pipeline_mode<synchronous>, transform_indices = @transform_4, window_bounds = array<i64: 1, 1>}]} {
    %c0_i32 = arith.constant 0 : i32
    %0 = arith.cmpi eq, %arg0, %c0_i32 : i32
    %1 = arith.extui %0 : i1 to i32
    %c0_i32_0 = arith.constant 0 : i32
    %2 = arith.cmpi ne, %1, %c0_i32_0 : i32
    scf.if %2 {
      %cst_30 = arith.constant 0.000000e+00 : f32
      %49 = vector.broadcast %cst_30 : f32 to vector<1x1xf32>
      %c0_31 = arith.constant 0 : index
      %c0_32 = arith.constant 0 : index
      %50 = vector.load %arg6[%c0_31, %c0_32] : memref<1x1xf32, #tpu.memory_space<vmem>>, vector<1x1xf32>
      tpu.vector_store %arg6[%c0_31, %c0_32], %49 {strides = array<i32>} : memref<1x1xf32, #tpu.memory_space<vmem>>, vector<1x1xf32>,
      %cst_33 = arith.constant 0.000000e+00 : f32
      %51 = vector.broadcast %cst_33 : f32 to vector<1x1xf32>
      %c0_34 = arith.constant 0 : index
      %c0_35 = arith.constant 0 : index
      %52 = vector.load %arg7[%c0_34, %c0_35] : memref<1x1xf32, #tpu.memory_space<vmem>>, vector<1x1xf32>
      tpu.vector_store %arg7[%c0_34, %c0_35], %51 {strides = array<i32>} : memref<1x1xf32, #tpu.memory_space<vmem>>, vector<1x1xf32>,
      %cst_36 = arith.constant 0.000000e+00 : f32
      %53 = vector.broadcast %cst_36 : f32 to vector<1x1xf32>
      %c0_37 = arith.constant 0 : index
      %c0_38 = arith.constant 0 : index
      %54 = vector.load %arg8[%c0_37, %c0_38] : memref<1x1xf32, #tpu.memory_space<vmem>>, vector<1x1xf32>
      tpu.vector_store %arg8[%c0_37, %c0_38], %53 {strides = array<i32>} : memref<1x1xf32, #tpu.memory_space<vmem>>, vector<1x1xf32>,
    } else {
    }
    %c0 = arith.constant 0 : index
    %c0_1 = arith.constant 0 : index
    %3 = vector.load %arg1[%c0, %c0_1] : memref<8x128xf32, #tpu.memory_space<vmem>>, vector<8x128xf32>
    %c0_2 = arith.constant 0 : index
    %c0_3 = arith.constant 0 : index
    %4 = vector.load %arg2[%c0_2, %c0_3] : memref<8x128xf32, #tpu.memory_space<vmem>>, vector<8x128xf32>
    %5 = math.exp %3 : vector<8x128xf32>
    %c0_4 = arith.constant 0 : index
    %c0_5 = arith.constant 0 : index
    %6 = vector.load %arg3[%c0_4, %c0_5] : memref<128x128xf32, #tpu.memory_space<vmem>>, vector<128x128xf32>
    %cst = arith.constant dense<0.000000e+00> : vector<8x128xf32>
    %7 = tpu.matmul %5, %6, %cst {dimension_numbers = #tpu.dot_dimension_numbers<[1], [0], [0], [1], [0, 0, 1, 1], [], []>} : vector<8x128xf32>, vector<128x128xf32>, vector<8x128xf32> -> vector<8x128xf32>
    %c0_6 = arith.constant 0 : index
    %c0_7 = arith.constant 0 : index
    %8 = vector.load %arg4[%c0_6, %c0_7] : memref<8x8xf32, #tpu.memory_space<vmem>>, vector<8x8xf32>
    %cst_8 = arith.constant dense<0.000000e+00> : vector<8x128xf32>
    %9 = tpu.matmul %8, %5, %cst_8 {dimension_numbers = #tpu.dot_dimension_numbers<[1], [0], [0], [1], [0, 0, 1, 1], [], []>} : vector<8x8xf32>, vector<8x128xf32>, vector<8x128xf32> -> vector<8x128xf32>
    %cst_9 = arith.constant dense<0.000000e+00> : vector<8xf32>
    %10 = vector.multi_reduction <add>, %9, %cst_9 [1] : vector<8x128xf32> to vector<8xf32>
    %11 = vector.shape_cast %10 : vector<8xf32> to vector<8x1xf32>
    %c0_10 = arith.constant 0 : index
    %c0_11 = arith.constant 0 : index
    %12 = vector.load %arg6[%c0_10, %c0_11] : memref<1x1xf32, #tpu.memory_space<vmem>>, vector<1x1xf32>
    %13 = vector.broadcast %12 : vector<1x1xf32> to vector<8x1xf32>
    %14 = arith.addf %13, %11 : vector<8x1xf32>
    %15 = vector.broadcast %14 : vector<8x1xf32> to vector<8x128xf32>
    %16 = arith.addf %15, %7 : vector<8x128xf32>
    %cst_12 = arith.constant 1.000000e-15 : f32
    %17 = vector.broadcast %cst_12 : f32 to vector<8x128xf32>
    %18 = arith.addf %16, %17 : vector<8x128xf32>
    %19 = math.log %18 : vector<8x128xf32>
    %20 = arith.subf %3, %19 : vector<8x128xf32>
    %c0_13 = arith.constant 0 : index
    %c0_14 = arith.constant 0 : index
    %21 = vector.load %arg7[%c0_13, %c0_14] : memref<1x1xf32, #tpu.memory_space<vmem>>, vector<1x1xf32>
    %22 = arith.mulf %20, %4 : vector<8x128xf32>
    %23 = vector.shape_cast %22 : vector<8x128xf32> to vector<1x8x128xf32>
    %cst_15 = arith.constant dense<0.000000e+00> : vector<1xf32>
    %24 = vector.multi_reduction <add>, %23, %cst_15 [1, 2] : vector<1x8x128xf32> to vector<1xf32>
    %25 = vector.shape_cast %24 : vector<1xf32> to vector<1x1x1xf32>
    %26 = vector.extract %25[0, 0, 0] : f32 from vector<1x1x1xf32>
    %27 = vector.broadcast %26 : f32 to vector<1x1xf32>
    %28 = arith.addf %21, %27 : vector<1x1xf32>
    %c0_16 = arith.constant 0 : index
    %c0_17 = arith.constant 0 : index
    %29 = vector.load %arg7[%c0_16, %c0_17] : memref<1x1xf32, #tpu.memory_space<vmem>>, vector<1x1xf32>
    tpu.vector_store %arg7[%c0_16, %c0_17], %28 {strides = array<i32>} : memref<1x1xf32, #tpu.memory_space<vmem>>, vector<1x1xf32>,
    %c0_18 = arith.constant 0 : index
    %c0_19 = arith.constant 0 : index
    %30 = vector.load %arg8[%c0_18, %c0_19] : memref<1x1xf32, #tpu.memory_space<vmem>>, vector<1x1xf32>
    %31 = vector.shape_cast %4 : vector<8x128xf32> to vector<1x8x128xf32>
    %cst_20 = arith.constant dense<0.000000e+00> : vector<1xf32>
    %32 = vector.multi_reduction <add>, %31, %cst_20 [1, 2] : vector<1x8x128xf32> to vector<1xf32>
    %33 = vector.shape_cast %32 : vector<1xf32> to vector<1x1x1xf32>
    %34 = vector.extract %33[0, 0, 0] : f32 from vector<1x1x1xf32>
    %35 = vector.broadcast %34 : f32 to vector<1x1xf32>
    %36 = arith.addf %30, %35 : vector<1x1xf32>
    %c0_21 = arith.constant 0 : index
    %c0_22 = arith.constant 0 : index
    %37 = vector.load %arg8[%c0_21, %c0_22] : memref<1x1xf32, #tpu.memory_space<vmem>>, vector<1x1xf32>
    tpu.vector_store %arg8[%c0_21, %c0_22], %36 {strides = array<i32>} : memref<1x1xf32, #tpu.memory_space<vmem>>, vector<1x1xf32>,
    %c0_23 = arith.constant 0 : index
    %c0_24 = arith.constant 0 : index
    %38 = vector.load %arg6[%c0_23, %c0_24] : memref<1x1xf32, #tpu.memory_space<vmem>>, vector<1x1xf32>
    %39 = vector.shape_cast %5 : vector<8x128xf32> to vector<1x8x128xf32>
    %cst_25 = arith.constant dense<0.000000e+00> : vector<1xf32>
    %40 = vector.multi_reduction <add>, %39, %cst_25 [1, 2] : vector<1x8x128xf32> to vector<1xf32>
    %41 = vector.shape_cast %40 : vector<1xf32> to vector<1x1x1xf32>
    %42 = vector.extract %41[0, 0, 0] : f32 from vector<1x1x1xf32>
    %43 = vector.broadcast %42 : f32 to vector<1x1xf32>
    %44 = arith.addf %38, %43 : vector<1x1xf32>
    %c0_26 = arith.constant 0 : index
    %c0_27 = arith.constant 0 : index
    %45 = vector.load %arg6[%c0_26, %c0_27] : memref<1x1xf32, #tpu.memory_space<vmem>>, vector<1x1xf32>
    tpu.vector_store %arg6[%c0_26, %c0_27], %44 {strides = array<i32>} : memref<1x1xf32, #tpu.memory_space<vmem>>, vector<1x1xf32>,
    %c0_i32_28 = arith.constant 0 : i32
    %46 = arith.cmpi eq, %arg0, %c0_i32_28 : i32
    %47 = arith.extui %46 : i1 to i32
    %c0_i32_29 = arith.constant 0 : i32
    %48 = arith.cmpi ne, %47, %c0_i32_29 : i32
    scf.if %48 {
      %c0_30 = arith.constant 0 : index
      %c0_31 = arith.constant 0 : index
      %49 = vector.load %arg7[%c0_30, %c0_31] : memref<1x1xf32, #tpu.memory_space<vmem>>, vector<1x1xf32>
      %c0_32 = arith.constant 0 : index
      %c0_33 = arith.constant 0 : index
      %50 = vector.load %arg8[%c0_32, %c0_33] : memref<1x1xf32, #tpu.memory_space<vmem>>, vector<1x1xf32>
      %cst_34 = arith.constant 0.000000e+00 : f32
      %51 = vector.broadcast %cst_34 : f32 to vector<1x1xf32>
      %52 = arith.cmpf ogt, %50, %51 : vector<1x1xf32>
      %cst_35 = arith.constant 0.000000e+00 : f32
      %53 = vector.broadcast %cst_35 : f32 to vector<1x1xf32>
      %54 = arith.subf %53, %49 : vector<1x1xf32>
      %55 = arith.divf %54, %50 : vector<1x1xf32>
      %cst_36 = arith.constant 0.000000e+00 : f32
      %56 = vector.broadcast %cst_36 : f32 to vector<1x1xf32>
      %57 = arith.select %52, %55, %56 : vector<1x1xi1>, vector<1x1xf32>
      %c0_37 = arith.constant 0 : index
      %c0_38 = arith.constant 0 : index
      %58 = vector.load %arg5[%c0_37, %c0_38] : memref<1x1xf32, #tpu.memory_space<vmem>>, vector<1x1xf32>
      tpu.vector_store %arg5[%c0_37, %c0_38], %57 {strides = array<i32>} : memref<1x1xf32, #tpu.memory_space<vmem>>, vector<1x1xf32>,
    } else {
    }
    return
  }
  func.func @transform_0(%arg0: i32) -> (i32, i32) {
    %c0_i32 = arith.constant 0 : i32
    %c0_i32_0 = arith.constant 0 : i32
    return %arg0, %c0_i32 : i32, i32
  }
  func.func @transform_1(%arg0: i32) -> (i32, i32) {
    %c0_i32 = arith.constant 0 : i32
    %c0_i32_0 = arith.constant 0 : i32
    return %arg0, %c0_i32 : i32, i32
  }
  func.func @transform_2(%arg0: i32) -> (i32, i32) {
    %c0_i32 = arith.constant 0 : i32
    %c0_i32_0 = arith.constant 0 : i32
    %c0_i32_1 = arith.constant 0 : i32
    return %c0_i32, %c0_i32_0 : i32, i32
  }
  func.func @transform_3(%arg0: i32) -> (i32, i32) {
    %c0_i32 = arith.constant 0 : i32
    %c0_i32_0 = arith.constant 0 : i32
    %c0_i32_1 = arith.constant 0 : i32
    return %c0_i32, %c0_i32_0 : i32, i32
  }
  func.func @transform_4(%arg0: i32) -> (i32, i32) {
    %c0_i32 = arith.constant 0 : i32
    %c0_i32_0 = arith.constant 0 : i32
    %c0_i32_1 = arith.constant 0 : i32
    return %c0_i32, %c0_i32_0 : i32, i32
  }
}

</mosaic_0001>

<bundles_post_ra>
// kernel: neg.1
= control target key start
LH: loop header
LB: loop body
LE: loop exit
PB: predicated region body
PF: predicated region fallthrough
CT: control target
= control target key end

     0   :  { %s24_s0 = inlined_call_operand.vmem [shape: f32[8], index: 0, kind: input, shape index: {}]   ;;  %s25_s1 = inlined_call_operand.vmem [shape: f32[8], index: 1, kind: output, shape index: {}]  }
   0x1   :  { %v2_v0 = vld [vmem:[%s24_s0] sm:$0x1] }
   0x2   :  { %v5_v1 = vxor.u32 2147483648, %v2_v0 }
   0x4   :  { %7 = vst [vmem:[%s25_s1] sm:$0x1] %v5_v1 }

// kernel: cox_loss.1
= control target key start
LH: loop header
LB: loop body
LE: loop exit
PB: predicated region body
PF: predicated region fallthrough
CT: control target
= control target key end

     0   :  { %vm22_vm0 = vcmask 0   ;;  %v404_v1 = vmov 0.0   ;;  %vm405_vm1 = vmmov 0   ;;  %s519_s0 = inlined_call_operand.vmem [shape: f32[8,128], index: 0, kind: input, shape index: {}]   ;;  %s520_s1 = inlined_call_operand.vmem [shape: f32[8,128], index: 1, kind: input, shape index: {}]   ;;  %s521_s2 = inlined_call_operand.vmem [shape: f32[128,128], index: 2, kind: input, shape index: {}]   ;;  %s522_s3 = inlined_call_operand.vmem [shape: f32[8,8], index: 3, kind: input, shape index: {}]   ;;  %s523_s4 = inlined_call_operand.hbm [shape: f32[1,1], index: 4, kind: output, shape index: {}]  }
   0x1   :  { %v437_v0 = vld [vmem:[%s519_s0] sm:$0xff]  ;;  %23 = vst.msk [vmem:[#allocation2] sm:$0x1] %vm22_vm0, %v404_v1  ;;  %333 = vmatprep.subr.mxu1 %v404_v1  ;;  %24 = vst.msk [vmem:[#allocation3] sm:$0x1] %vm22_vm0, %v404_v1  ;;  %335 = vmatprep.mubr.msk.f32.mxu1 %vm405_vm1, %v404_v1 }
   0x2   :  { %25 = vst.msk [vmem:[#allocation4] sm:$0x1] %vm22_vm0, %v404_v1  ;;  %v28_v2 = vmul.f32 1.442695, %v437_v0 }
   0x3   :  { %9 = vsyncpa [#allocation6], 0  ;;  %330 = vmatprep.mubr.msk.f32.mxu0 %vm405_vm1, %v404_v1  ;;  %v116_v3 = vld [vmem:[%s522_s3] sm:$0xff]  ;;  %vm117_vm2 = vcmask 64512   ;;  %v31_v6 = vld [vmem:[%s521_s2 + $0x8] sm:$0xff]  ;;  %v406_v8 = vmov 0.0|0.0  }
   0x4   :  { %374 = vpow2.f32 %v28_v2  ;;  %v30_v5 = vld [vmem:[%s521_s2] sm:$0xff]  ;;  %v32_v7 = vld [vmem:[%s521_s2 + $0x10] sm:$0xff]  ;;  %338 = vmatprep.subr.bf16.mxu0 %v406_v8  ;;  %v33_v10 = vld [vmem:[%s521_s2 + $0x18] sm:$0xff]  ;;  %v407_v32 = vmov 0   ;;  %s408_s24 = smov [#allocation5]  }
   0x5   :  { %v339_v9 = vpack.c.bf16 %v31_v6, %v30_v5  ;;  %v342_v11 = vpack.c.bf16 %v33_v10, %v32_v7  ;;  %v34_v12 = vld [vmem:[%s521_s2 + $0x20] sm:$0xff]  ;;  %v35_v13 = vld [vmem:[%s521_s2 + $0x28] sm:$0xff]  ;;  %v36_v15 = vld [vmem:[%s521_s2 + $0x30] sm:$0xff]  ;;  %373 = vset.pattern.permute.xlu0 %v407_v32  ;;  %s269_s25 = sshll.u32 %s408_s24, 4  ;;  %s270_s25 = int_to_ptr.vmem [resolvable:$true] %s269_s25 }
   0x6   :  { %v345_v14 = vpack.c.bf16 %v35_v13, %v34_v12  ;;  %v37_v16 = vld [vmem:[%s521_s2 + $0x38] sm:$0xff]  ;;  %v38_v18 = vld [vmem:[%s521_s2 + $0x40] sm:$0xff]  ;;  %v39_v19 = vld [vmem:[%s521_s2 + $0x48] sm:$0xff]  ;;  %s380_s26 = scalar_lea.vmem %s270_s25, 16  ;;  %s384_s27 = scalar_lea.vmem %s270_s25, 32 }
   0x7   :  { %340 = vmatpush3.bf16.msra.mxu0 %v339_v9  ;;  %v348_v17 = vpack.c.bf16 %v37_v16, %v36_v15  ;;  %v351_v20 = vpack.c.bf16 %v39_v19, %v38_v18  ;;  %v40_v21 = vld [vmem:[%s521_s2 + $0x50] sm:$0xff]  ;;  %v41_v22 = vld [vmem:[%s521_s2 + $0x58] sm:$0xff]  ;;  %v42_v24 = vld [vmem:[%s521_s2 + $0x60] sm:$0xff]  ;;  %p381_p0 = scmp.ne.s32.totalorder %s270_s25, %s380_s26  ;;  %p385_p1 = scmp.lt.s32.totalorder %s270_s25, %s270_s25 }
   0x8   :  { %341 = vmatprep.subr.bf16.mxu0 %v406_v8  ;;  %v354_v23 = vpack.c.bf16 %v41_v22, %v40_v21  ;;  %v43_v25 = vld [vmem:[%s521_s2 + $0x68] sm:$0xff]  ;;  %v44_v27 = vld [vmem:[%s521_s2 + $0x70] sm:$0xff]  ;;  %v45_v28 = vld [vmem:[%s521_s2 + $0x78] sm:$0xff]  ;;  %p386_p2 = scmp.lt.s32.totalorder %s384_s27, %s380_s26 }
   0x9   :  { %v357_v26 = vpack.c.bf16 %v43_v25, %v42_v24  ;;  %v360_v29 = vpack.c.bf16 %v45_v28, %v44_v27  ;;  %v278_v35 = vld [vmem:[#allocation2] ss:$0 sm:$0xff]  ;;  %v226_v6 = vld [vmem:[#allocation4] sm:$0x1] }
   0xa   :  { %v27_v43 = vld [vmem:[%s520_s1] sm:$0xff]  ;;  %p387_p3 = por %p386_p2, %p385_p1 }
   0xb   :  { %343 = vmatpush3.bf16.msra.mxu0 %v342_v11  ;;  %v239_v9 = vld [vmem:[#allocation2] sm:$0x1] }
   0xc   :  { %344 = vmatprep.subr.bf16.mxu0 %v406_v8  ;;  %p388_p4 = pnand %p387_p3, %p381_p0 }
   0xe   :  { %v446_v4 = vpop.eup %374 }
   0xf   :  { %334 = vmatpush3.msra.mxu1 %v446_v4  ;;  %346 = vmatpush3.bf16.msra.mxu0 %v345_v14 }
  0x10   :  { %336 = vmatmul.mubr.msk.f32.vlgmr.msra.gmra.mrb[0].mxu1 %vm117_vm2, %v116_v3  ;;  %347 = vmatprep.subr.bf16.mxu0 %v406_v8  ;;  %v211_v3 = vld [vmem:[#allocation3] sm:$0x1] }
  0x13   :  { %349 = vmatpush3.bf16.msra.mxu0 %v348_v17 }
  0x14   :  { %350 = vmatprep.subr.bf16.mxu0 %v406_v8 }
  0x17   :  { %352 = vmatpush3.bf16.msra.mxu0 %v351_v20 }
  0x18   :  { %353 = vmatprep.subr.bf16.mxu0 %v406_v8 }
  0x1b   :  { %355 = vmatpush3.bf16.msra.mxu0 %v354_v23 }
  0x1c   :  { %356 = vmatprep.subr.bf16.mxu0 %v406_v8 }
  0x1f   :  { %358 = vmatpush3.bf16.msra.mxu0 %v357_v26 }
  0x20   :  { %359 = vmatprep.subr.bf16.mxu0 %v406_v8 }
  0x23   :  { %361 = vmatpush3.bf16.msra.mxu0 %v360_v29 }
  0x26   :  { %331 = vmatmul.mubr.f32.vlgmr.msra.gmra.mrb[0].mxu0 %v446_v4 }
  0xe3   :  { %v187_v30 = vpop.f32.mrb[0].mxu1 }
  0xe4   :  { %191 = vadd.xlane.f32.xlu0 %v187_v30  ;;  %v337_v31 = vpop.f32.mrb[1].mxu1 }
  0xf9   :  { %v112_v33 = vpop.f32.mrb[0].mxu0 }
  0xfa   :  { %v332_v34 = vpop.f32.mrb[1].mxu0 }
 0x171   :  { %v192_v36 = vpop.xlane.xlu0 %191 }
 0x172   :  { %v200_v37 = vadd.f32 %v278_v35, %v192_v36 }
 0x174   :  { %203 = vperm.xlu0 %373, %v200_v37  }
 0x1f3   :  { %v204_v38 = vpop.permute.xlu0 %203 }
 0x1f4   :  { %v206_v39 = vadd.f32 %v204_v38, %v112_v33 }
 0x1f6   :  { %v207_v40 = vadd.f32 1e-15, %v206_v39 }
 0x1f8   :  { %376 = vlog2.f32 %v207_v40 }
 0x202   :  { %v377_v41 = vpop.eup %376 }
 0x203   :  { %v209_v42 = vmul.f32 0.6931472, %v377_v41 }
 0x205   :  { %v210_v44 = vsub.f32 %v437_v0, %v209_v42 }
 0x207   :  { %v212_v45 = vmul.f32 %v210_v44, %v27_v43 }
 0x209   :  { %213 = vadd.xlane.f32.xlu1 %v212_v45 }
 0x20d   :  { %227 = vadd.xlane.f32.xlu1 %v27_v43 }
 0x211   :  { %240 = vadd.xlane.f32.xlu1 %v446_v4 }
 0x296   :  { %v214_v46 = vpop.xlane.xlu1 %213 }
 0x297   :  { %v215_v47 = vrot.slane %v214_v46, 4 }
 0x299   :  { %v216_v48 = vadd.f32 %v215_v47, %v214_v46 }
 0x29a   :  { %v228_v49 = vpop.xlane.xlu1 %227 }
 0x29b   :  { %v217_v50 = vrot.slane %v216_v48, 2  ;;  %v229_v51 = vrot.slane %v228_v49, 4 }
 0x29d   :  { %v230_v52 = vadd.f32 %v229_v51, %v228_v49  ;;  %v218_v53 = vadd.f32 %v217_v50, %v216_v48 }
 0x29e   :  { %v241_v54 = vpop.xlane.xlu1 %240 }
 0x29f   :  { %v231_v55 = vrot.slane %v230_v52, 2  ;;  %v219_v56 = vrot.slane %v218_v53, 1  ;;  %v242_v57 = vrot.slane %v241_v54, 4 }
 0x2a1   :  { %v220_v58 = vadd.f32 %v219_v56, %v218_v53  ;;  %v232_v59 = vadd.f32 %v231_v55, %v230_v52  ;;  %v243_v60 = vadd.f32 %v242_v57, %v241_v54 }
 0x2a3   :  { %362 = vpush %v220_v58  ;;  %v233_v61 = vrot.slane %v232_v59, 1  ;;  %v244_v62 = vrot.slane %v243_v60, 2 }
 0x2a5   :  { %v234_v63 = vadd.f32 %v233_v61, %v232_v59  ;;  %v245_v0 = vadd.f32 %v244_v62, %v243_v60 }
 0x2a7   :  { %364 = vpush %v234_v63  ;;  %v246_v1 = vrot.slane %v245_v0, 1 }
 0x2a9   :  { %v247_v2 = vadd.f32 %v246_v1, %v245_v0 }
 0x2ab   :  { %366 = vpush %v247_v2 }
 0x2d4   :  { %s363_s1 = spop %362 }
 0x2d5   :  { %v222_v4 = vstv %s363_s1 }
 0x2d6   :  { %v223_v5 = vadd.f32 %v222_v4, %v211_v3 }
 0x2d8   :  { %225 = vst.msk [vmem:[#allocation3] sm:$0x1] %vm22_vm0, %v223_v5  ;;  %s365_s23 = spop %364 }
 0x2d9   :  { %v236_v7 = vstv %s365_s23 }
 0x2da   :  { %v237_v8 = vadd.f32 %v236_v7, %v226_v6 }
 0x2dc   :  { %238 = vst.msk [vmem:[#allocation4] sm:$0x1] %vm22_vm0, %v237_v8  ;;  %s367_s3 = spop %366 }
 0x2dd   :  { %v249_v10 = vstv %s367_s3 }
 0x2de   :  { %v250_v11 = vadd.f32 %v249_v10, %v239_v9 }
 0x2df   :  { %v255_v13 = vld [vmem:[#allocation3] sm:$0x1] }
 0x2e0   :  { %251 = vst.msk [vmem:[#allocation2] sm:$0x1] %vm22_vm0, %v250_v11  ;;  %v258_v14 = vsub.f32 0.0, %v255_v13 }
 0x2e3   :  { %v256_v12 = vld [vmem:[#allocation4] sm:$0x1] }
 0x2e4   :  { %378 = vrcp.f32 %v256_v12  ;;  %vm257_vm3 = vcmp.gt.f32.partialorder %v256_v12, 0.0 }
 0x2ee   :  { %v379_v15 = vpop.eup %378 }
 0x2ef   :  { %v260_v16 = vmul.f32 %v379_v15, %v258_v14 }
 0x2f1   :  { %v261_v17 = vsel %vm257_vm3, %v260_v16, 0.0 }
 0x2f2   :  { %262 = vst.msk [vmem:[#allocation5] sm:$0x1] %vm22_vm0, %v261_v17 }
 0x2f3   :  { %391 = shalt.err (!%p388_p4)
}
 0x2f4   :  { %s392_s30 = scalar_lea.hbm %s523_s4, 16 }
 0x2f5   :  { %p393_p5 = scmp.ne.s32.totalorder %s523_s4, %s392_s30  ;;  %p396_p6 = scmp.lt.u32.totalorder %s392_s30, %s523_s4 }
 0x2f7   :  { %p398_p7 = pnand %p396_p6, %p393_p5 }
 0x2f9   :  { %401 = shalt.err (!%p398_p7)
}
 0x2fa   :  { %272 = dma.vmem_to_hbm [thread:$0]  %s270_s25, 16, %s523_s4, [#allocation6]  }
 0x2fb   :  { %402 = dma.done.wait [#allocation6], 16  }
 0x2fc   :  { %403 = vsyncadd [#allocation6], 4294967280 }
 0x2fd   :  { %276 = vsyncpa [#allocation6], 1 }

</bundles_post_ra>
